<compile_context>
chip_gen: v7x
topology: tpu7x:2x2x1
jax: 0.10.0
libtpu: 0.0.40
codegen_flags: <defaults>
</compile_context>

<pallas_src>
import jax
import jax.numpy as jnp
from jax.experimental import pallas as pl
from jax.experimental.pallas import tpu as pltpu


def _round_up(v, m):
    return (v + m - 1) // m * m


def actor_kernel(x_ref, w1_ref, b1_ref, w2_ref, b2_ref, w3_ref, b3_ref, o_ref):
    # Fused 3-layer MLP on one batch tile.
    # Layer 1: K = in_dim (8) -> negligible FLOPs, keep it in f32 for accuracy.
    h1 = jnp.dot(x_ref[...], w1_ref[...],
                 preferred_element_type=jnp.float32) + b1_ref[...]
    h1 = jnp.maximum(h1, 0.0)

    # Layers 2/3: bf16 MXU inputs, f32 accumulation; bias/ReLU/tanh in f32.
    h2 = jnp.dot(h1.astype(jnp.bfloat16), w2_ref[...],
                 preferred_element_type=jnp.float32) + b2_ref[...]
    h2 = jnp.maximum(h2, 0.0)

    h3 = jnp.dot(h2.astype(jnp.bfloat16), w3_ref[...],
                 preferred_element_type=jnp.float32) + b3_ref[...]
    o_ref[...] = jnp.tanh(h3).astype(o_ref.dtype)


def prepare_actor_params(params):
    """One-time weight prep: cast the 256-wide layers to bf16 for the MXU.

    Do this ONCE (outside the per-step forward) so the casts are not re-run
    on every call.  Layer-1 weights stay f32 (K = 8 matmul runs in f32).
    """
    return {
        "w1": params["w1"].astype(jnp.float32),
        "b1": params["b1"].astype(jnp.float32),
        "w2": params["w2"].astype(jnp.bfloat16),
        "b2": params["b2"].astype(jnp.float32),
        "w3": params["w3"].astype(jnp.bfloat16),
        "b3": params["b3"].astype(jnp.float32),
    }


def actor_forward(x, prepared, tile_b=2048):
    """x: (B, input_dim) float32. prepared: output of prepare_actor_params.

    tile_b is NOT VMEM-limited on any generation (per-step footprint is a few
    MB vs. 32+ MiB of scoped VMEM); it just amortizes the ~0.35 us per-grid-
    step overhead and gives layer 2 a deep M for MXU pipelining.  For batches
    spanning more than one minimal tile we split into >= 2 grid steps so both
    v7x TensorCores get work (harmless on single-TC v5e/v6e).
    """
    w1, b1 = prepared["w1"], prepared["b1"]
    w2, b2 = prepared["w2"], prepared["b2"]
    w3, b3 = prepared["w3"], prepared["b3"]

    batch, in_dim = x.shape
    hidden = w1.shape[1]
    out_dim = w3.shape[1]

    # Sublane-aligned batch; pad to a tile multiple so every grid step sees a
    # full, aligned block (padded rows sliced off below).
    b_aligned = _round_up(batch, 8)
    if b_aligned > 256:
        # Ensure >= 2 grid steps for v7x's two TensorCores.
        tile_b = min(tile_b, _round_up(pl.cdiv(b_aligned, 2), 256))
    tile_b = max(8, min(tile_b, b_aligned))
    b_padded = _round_up(b_aligned, tile_b)
    if b_padded != batch:
        x = jnp.pad(x, ((0, b_padded - batch), (0, 0)))

    grid = (b_padded // tile_b,)

    flops = 2 * b_padded * (in_dim * hidden + hidden * hidden + hidden * out_dim)
    bytes_accessed = (
        x.size * 4                                     # x in (f32)
        + b_padded * out_dim * 4                       # out (f32, unpadded)
        + w1.size * 4 + (w2.size + w3.size) * 2        # f32 w1, bf16 w2/w3
        + (b1.size + b2.size + b3.size) * 4            # f32 biases
    )

    out = pl.pallas_call(
        actor_kernel,
        out_shape=jax.ShapeDtypeStruct((b_padded, out_dim), jnp.float32),
        grid_spec=pltpu.PrefetchScalarGridSpec(
            num_scalar_prefetch=0,
            grid=grid,
            in_specs=[
                pl.BlockSpec((tile_b, in_dim), lambda i: (i, 0)),   # x tile
                pl.BlockSpec((in_dim, hidden), lambda i: (0, 0)),   # w1 (resident)
                pl.BlockSpec((1, hidden), lambda i: (0, 0)),        # b1
                pl.BlockSpec((hidden, hidden), lambda i: (0, 0)),   # w2
                pl.BlockSpec((1, hidden), lambda i: (0, 0)),        # b2
                pl.BlockSpec((hidden, out_dim), lambda i: (0, 0)),  # w3 (unpadded)
                pl.BlockSpec((1, out_dim), lambda i: (0, 0)),       # b3
            ],
            out_specs=pl.BlockSpec((tile_b, out_dim), lambda i: (i, 0)),
        ),
        compiler_params=pltpu.CompilerParams(
            dimension_semantics=("parallel",),
        ),
        cost_estimate=pl.CostEstimate(
            flops=flops,
            transcendentals=b_padded * out_dim,
            bytes_accessed=bytes_accessed,
        ),
    )(x, w1, b1, w2, b2, w3, b3)

    return out[:batch, :]


def init_actor_params(key, input_dim, output_dim, hidden=256):
    """Deterministic synthetic init (PyTorch-Linear-style uniform bounds)."""
    def linear(k, fan_in, fan_out):
        k_w, k_b = jax.random.split(k)
        bound = 1.0 / jnp.sqrt(fan_in)
        # stored as (in, out): transpose of PyTorch's (out, in) layout
        w = jax.random.uniform(k_w, (fan_in, fan_out), jnp.float32, -bound, bound)
        b = jax.random.uniform(k_b, (1, fan_out), jnp.float32, -bound, bound)
        return w, b

    k1, k2, k3 = jax.random.split(key, 3)
    w1, b1 = linear(k1, input_dim, hidden)
    w2, b2 = linear(k2, hidden, hidden)
    w3, b3 = linear(k3, hidden, output_dim)
    return {"w1": w1, "b1": b1, "w2": w2, "b2": b2, "w3": w3, "b3": b3}


def actor_reference(x, params):
    h1 = jnp.maximum(x @ params["w1"] + params["b1"], 0.0)
    h2 = jnp.maximum(h1 @ params["w2"] + params["b2"], 0.0)
    return jnp.tanh(h2 @ params["w3"] + params["b3"])


if __name__ == "__main__":
    # LunarLander-v2 (continuous): obs dim = 8, action dim = 2
    INPUT_DIM, OUTPUT_DIM = 8, 2

    key = jax.random.PRNGKey(0)
    k_params, k_x1, k_x2, k_x3 = jax.random.split(key, 4)
    params = init_actor_params(k_params, INPUT_DIM, OUTPUT_DIM)
    prepared = prepare_actor_params(params)  # one-time bf16 weight prep

    # Small act()-style batch, a non-multiple-of-8 batch (padding path), and a
    # larger training-style batch that exercises the >= 2-step grid path.
    for bsz, k in ((2, k_x1), (19, k_x2), (600, k_x3)):
        x = jax.random.normal(k, (bsz, INPUT_DIM), jnp.float32)
        out = jax.block_until_ready(actor_forward(x, prepared))
        ref = actor_reference(x, params)
        assert out.shape == (bsz, OUTPUT_DIM)
        # bf16 MXU inputs on layers 2/3 with f32 accumulation -> loosened tol.
        assert jnp.allclose(out, ref, atol=2e-2, rtol=2e-2), "mismatch vs reference"

    print("KERNEL_OK")
</pallas_src>

<mosaic_0001>
module attributes {stable_mosaic.version = 11 : i64} {
  func.func @actor_kernel(%arg0: i32, %arg1: memref<8x8xf32, #tpu.memory_space<vmem>>, %arg2: memref<8x256xf32, #tpu.memory_space<vmem>>, %arg3: memref<1x256xf32, #tpu.memory_space<vmem>>, %arg4: memref<256x256xbf16, #tpu.memory_space<vmem>>, %arg5: memref<1x256xf32, #tpu.memory_space<vmem>>, %arg6: memref<256x2xbf16, #tpu.memory_space<vmem>>, %arg7: memref<1x2xf32, #tpu.memory_space<vmem>>, %arg8: memref<8x2xf32, #tpu.memory_space<vmem>>) attributes {dimension_semantics = [#tpu.dimension_semantics<parallel>], iteration_bounds = array<i64: 1>, scalar_prefetch = 0 : i64, scratch_operands = 0 : i64, tpu.core_type = #tpu.core_type<tc>, window_params = [{transform_indices = @transform_0, window_bounds = array<i64: 8, 8>}, {pipeline_mode = #tpu.pipeline_mode<synchronous>, transform_indices = @transform_1, window_bounds = array<i64: 8, 256>}, {pipeline_mode = #tpu.pipeline_mode<synchronous>, transform_indices = @transform_2, window_bounds = array<i64: 1, 256>}, {pipeline_mode = #tpu.pipeline_mode<synchronous>, transform_indices = @transform_3, window_bounds = array<i64: 256, 256>}, {pipeline_mode = #tpu.pipeline_mode<synchronous>, transform_indices = @transform_4, window_bounds = array<i64: 1, 256>}, {pipeline_mode = #tpu.pipeline_mode<synchronous>, transform_indices = @transform_5, window_bounds = array<i64: 256, 2>}, {pipeline_mode = #tpu.pipeline_mode<synchronous>, transform_indices = @transform_6, window_bounds = array<i64: 1, 2>}, {transform_indices = @transform_7, window_bounds = array<i64: 8, 2>}]} {
    %c0 = arith.constant 0 : index
    %c0_0 = arith.constant 0 : index
    %0 = vector.load %arg1[%c0, %c0_0] : memref<8x8xf32, #tpu.memory_space<vmem>>, vector<8x8xf32>
    %c0_1 = arith.constant 0 : index
    %c0_2 = arith.constant 0 : index
    %1 = vector.load %arg2[%c0_1, %c0_2] : memref<8x256xf32, #tpu.memory_space<vmem>>, vector<8x256xf32>
    %cst = arith.constant dense<0.000000e+00> : vector<8x256xf32>
    %2 = tpu.matmul %0, %1, %cst {dimension_numbers = #tpu.dot_dimension_numbers<[1], [0], [0], [1], [0, 0, 1, 1], [], []>} : vector<8x8xf32>, vector<8x256xf32>, vector<8x256xf32> -> vector<8x256xf32>
    %c0_3 = arith.constant 0 : index
    %c0_4 = arith.constant 0 : index
    %3 = vector.load %arg3[%c0_3, %c0_4] : memref<1x256xf32, #tpu.memory_space<vmem>>, vector<1x256xf32>
    %4 = vector.broadcast %3 : vector<1x256xf32> to vector<8x256xf32>
    %5 = arith.addf %2, %4 : vector<8x256xf32>
    %cst_5 = arith.constant 0.000000e+00 : f32
    %6 = vector.broadcast %cst_5 : f32 to vector<8x256xf32>
    %7 = arith.maximumf %5, %6 : vector<8x256xf32>
    %8 = arith.truncf %7 : vector<8x256xf32> to vector<8x256xbf16>
    %c0_6 = arith.constant 0 : index
    %c0_7 = arith.constant 0 : index
    %9 = vector.load %arg4[%c0_6, %c0_7] : memref<256x256xbf16, #tpu.memory_space<vmem>>, vector<256x256xbf16>
    %cst_8 = arith.constant dense<0.000000e+00> : vector<8x256xf32>
    %10 = tpu.matmul %8, %9, %cst_8 {dimension_numbers = #tpu.dot_dimension_numbers<[1], [0], [0], [1], [0, 0, 1, 1], [], []>} : vector<8x256xbf16>, vector<256x256xbf16>, vector<8x256xf32> -> vector<8x256xf32>
    %c0_9 = arith.constant 0 : index
    %c0_10 = arith.constant 0 : index
    %11 = vector.load %arg5[%c0_9, %c0_10] : memref<1x256xf32, #tpu.memory_space<vmem>>, vector<1x256xf32>
    %12 = vector.broadcast %11 : vector<1x256xf32> to vector<8x256xf32>
    %13 = arith.addf %10, %12 : vector<8x256xf32>
    %cst_11 = arith.constant 0.000000e+00 : f32
    %14 = vector.broadcast %cst_11 : f32 to vector<8x256xf32>
    %15 = arith.maximumf %13, %14 : vector<8x256xf32>
    %16 = arith.truncf %15 : vector<8x256xf32> to vector<8x256xbf16>
    %c0_12 = arith.constant 0 : index
    %c0_13 = arith.constant 0 : index
    %17 = vector.load %arg6[%c0_12, %c0_13] : memref<256x2xbf16, #tpu.memory_space<vmem>>, vector<256x2xbf16>
    %cst_14 = arith.constant dense<0.000000e+00> : vector<8x2xf32>
    %18 = tpu.matmul %16, %17, %cst_14 {dimension_numbers = #tpu.dot_dimension_numbers<[1], [0], [0], [1], [0, 0, 1, 1], [], []>} : vector<8x256xbf16>, vector<256x2xbf16>, vector<8x2xf32> -> vector<8x2xf32>
    %c0_15 = arith.constant 0 : index
    %c0_16 = arith.constant 0 : index
    %19 = vector.load %arg7[%c0_15, %c0_16] : memref<1x2xf32, #tpu.memory_space<vmem>>, vector<1x2xf32>
    %20 = vector.broadcast %19 : vector<1x2xf32> to vector<8x2xf32>
    %21 = arith.addf %18, %20 : vector<8x2xf32>
    %22 = math.tanh %21 : vector<8x2xf32>
    %c0_17 = arith.constant 0 : index
    %c0_18 = arith.constant 0 : index
    %23 = vector.load %arg8[%c0_17, %c0_18] : memref<8x2xf32, #tpu.memory_space<vmem>>, vector<8x2xf32>
    tpu.vector_store %arg8[%c0_17, %c0_18], %22 {strides = array<i32>} : memref<8x2xf32, #tpu.memory_space<vmem>>, vector<8x2xf32>,
    return
  }
  func.func @transform_0(%arg0: i32) -> (i32, i32) {
    %c0_i32 = arith.constant 0 : i32
    %c0_i32_0 = arith.constant 0 : i32
    return %arg0, %c0_i32 : i32, i32
  }
  func.func @transform_1(%arg0: i32) -> (i32, i32) {
    %c0_i32 = arith.constant 0 : i32
    %c0_i32_0 = arith.constant 0 : i32
    %c0_i32_1 = arith.constant 0 : i32
    return %c0_i32, %c0_i32_0 : i32, i32
  }
  func.func @transform_2(%arg0: i32) -> (i32, i32) {
    %c0_i32 = arith.constant 0 : i32
    %c0_i32_0 = arith.constant 0 : i32
    %c0_i32_1 = arith.constant 0 : i32
    return %c0_i32, %c0_i32_0 : i32, i32
  }
  func.func @transform_3(%arg0: i32) -> (i32, i32) {
    %c0_i32 = arith.constant 0 : i32
    %c0_i32_0 = arith.constant 0 : i32
    %c0_i32_1 = arith.constant 0 : i32
    return %c0_i32, %c0_i32_0 : i32, i32
  }
  func.func @transform_4(%arg0: i32) -> (i32, i32) {
    %c0_i32 = arith.constant 0 : i32
    %c0_i32_0 = arith.constant 0 : i32
    %c0_i32_1 = arith.constant 0 : i32
    return %c0_i32, %c0_i32_0 : i32, i32
  }
  func.func @transform_5(%arg0: i32) -> (i32, i32) {
    %c0_i32 = arith.constant 0 : i32
    %c0_i32_0 = arith.constant 0 : i32
    %c0_i32_1 = arith.constant 0 : i32
    return %c0_i32, %c0_i32_0 : i32, i32
  }
  func.func @transform_6(%arg0: i32) -> (i32, i32) {
    %c0_i32 = arith.constant 0 : i32
    %c0_i32_0 = arith.constant 0 : i32
    %c0_i32_1 = arith.constant 0 : i32
    return %c0_i32, %c0_i32_0 : i32, i32
  }
  func.func @transform_7(%arg0: i32) -> (i32, i32) {
    %c0_i32 = arith.constant 0 : i32
    %c0_i32_0 = arith.constant 0 : i32
    return %arg0, %c0_i32 : i32, i32
  }
}

</mosaic_0001>

<bundles_post_ra>
// kernel: tpu_custom_call.1
= control target key start
LH: loop header
LB: loop body
LE: loop exit
PB: predicated region body
PF: predicated region fallthrough
CT: control target
= control target key end

     0   :  { %12 = vsyncpa [#allocation3], 0  ;;  %s733_s24 = smov [#allocation2]   ;;  %s858_s0 = inlined_call_operand.vmem [shape: f32[8,8], index: 0, kind: input, shape index: {}]   ;;  %s859_s1 = inlined_call_operand.vmem [shape: f32[8,256], index: 1, kind: input, shape index: {}]   ;;  %s860_s2 = inlined_call_operand.vmem [shape: f32[1,256], index: 2, kind: input, shape index: {}]   ;;  %s861_s3 = inlined_call_operand.hbm [shape: bf16[256,256], index: 3, kind: input, shape index: {}]   ;;  %s862_s4 = inlined_call_operand.vmem [shape: f32[1,256], index: 4, kind: input, shape index: {}]   ;;  %s863_s5 = inlined_call_operand.vmem [shape: bf16[256,2], index: 5, kind: input, shape index: {}]   ;;  %s864_s6 = inlined_call_operand.vmem [shape: f32[1,2], index: 6, kind: input, shape index: {}]   ;;  %s865_s7 = inlined_call_operand.vmem [shape: f32[8,2], index: 7, kind: output, shape index: {}]  }
   0x1   :  { %s24_s25 = sshll.u32 %s733_s24, 4  ;;  %s709_s28 = scalar_lea.hbm %s861_s3, 4096  ;;  %s25_s25 = int_to_ptr.vmem [resolvable:$true] %s24_s25 }
   0x2   :  { %p710_p0 = scmp.ne.s32.totalorder %s861_s3, %s709_s28  ;;  %p713_p1 = scmp.lt.u32.totalorder %s709_s28, %s861_s3 }
   0x4   :  { %p715_p2 = pnand %p713_p1, %p710_p0 }
   0x6   :  { %718 = shalt.err (!%p715_p2)
}
   0x7   :  { %s719_s10 = scalar_lea.vmem %s25_s25, 4096  ;;  %p724_p4 = scmp.lt.s32.totalorder %s25_s25, %s25_s25 }
   0x8   :  { %p720_p3 = scmp.ne.s32.totalorder %s25_s25, %s719_s10  ;;  %p725_p5 = scmp.lt.s32.totalorder %s719_s10, %s719_s10 }
   0xa   :  { %p726_p6 = por %p725_p5, %p724_p4 }
   0xc   :  { %p727_p7 = pnand %p726_p6, %p720_p3 }
   0xe   :  { %730 = shalt.err (!%p727_p7)
}
   0xf   :  { %s734_s11 = smov 128   ;;  %s735_s12 = smov 8  }
  0x10   :  { %30 = dma.hbm_to_vmem [thread:$0]  %s861_s3, 4096, %s25_s25, [#allocation3], %s734_s11, %s734_s11, %s735_s12  }
  0x11   :  { %731 = dma.done.wait [#allocation3], 4096  }
  0x12   :  { %732 = vsyncadd [#allocation3], 4294963200  ;;  %v736_v0 = vmov 0.0   ;;  %v43_v1 = vld [vmem:[%s859_s1 + $0x8] sm:$0xff]  ;;  %v42_v2 = vld [vmem:[%s859_s1] sm:$0xff]  ;;  %vm56_vm0 = vcmask 64512   ;;  %v46_v48 = vlaneseq }
  0x13   :  { %124 = vmatprep.mubr.f32.mxu0 %v736_v0  ;;  %v41_v3 = vld [vmem:[%s858_s0] sm:$0xff]  ;;  %60 = vmatprep.subr.mxu0 %v43_v1  ;;  %v646_v6 = vld [vmem:[#allocation2 + $0x14] ss:$8 sps:$4 sm:$0xff]   ;;  %v648_v7 = vld [vmem:[#allocation2 + $0x10] ss:$8 sps:$4 sm:$0xff]   ;;  %vm560_vm1 = vcmask 15360  }
  0x14   :  { %v643_v4 = vld [vmem:[#allocation2 + $0x4] ss:$8 sps:$4 sm:$0xff]   ;;  %61 = vmatpush1.msra.mxu0 %v42_v2  ;;  %v645_v5 = vld [vmem:[#allocation2] ss:$8 sps:$4 sm:$0xff]   ;;  %v652_v10 = vld [vmem:[#allocation2 + $0x34] ss:$8 sps:$4 sm:$0xff]  }
  0x15   :  { %567 = vmatmul.mubr.msk.f32.vlgmr.msra.gmra.mrb[0].mxu0 %vm56_vm0, %v41_v3  ;;  %339 = vmatprep.subr.bf16.mxu1 %v643_v4  ;;  %v649_v8 = vld [vmem:[#allocation2 + $0x24] ss:$8 sps:$4 sm:$0xff]   ;;  %v651_v9 = vld [vmem:[#allocation2 + $0x20] ss:$8 sps:$4 sm:$0xff]   ;;  %v654_v11 = vld [vmem:[#allocation2 + $0x30] ss:$8 sps:$4 sm:$0xff]  }
  0x16   :  { %340 = vmatpush1.bf16.msra.mxu1 %v645_v5  ;;  %v655_v12 = vld [vmem:[#allocation2 + $0x44] ss:$8 sps:$4 sm:$0xff]   ;;  %v657_v13 = vld [vmem:[#allocation2 + $0x40] ss:$8 sps:$4 sm:$0xff]   ;;  %v658_v14 = vld [vmem:[#allocation2 + $0x54] ss:$8 sps:$4 sm:$0xff]  }
  0x17   :  { %341 = vmatprep.subr.bf16.mxu1 %v646_v6  ;;  %v660_v15 = vld [vmem:[#allocation2 + $0x50] ss:$8 sps:$4 sm:$0xff]   ;;  %v661_v16 = vld [vmem:[#allocation2 + $0x64] ss:$8 sps:$4 sm:$0xff]   ;;  %v663_v17 = vld [vmem:[#allocation2 + $0x60] ss:$8 sps:$4 sm:$0xff]  }
  0x18   :  { %v664_v18 = vld [vmem:[#allocation2 + $0x74] ss:$8 sps:$4 sm:$0xff]   ;;  %v666_v19 = vld [vmem:[#allocation2 + $0x70] ss:$8 sps:$4 sm:$0xff]   ;;  %v667_v20 = vld [vmem:[#allocation2 + $0x84] ss:$8 sps:$4 sm:$0xff]  }
  0x19   :  { %v669_v21 = vld [vmem:[#allocation2 + $0x80] ss:$8 sps:$4 sm:$0xff]   ;;  %v670_v22 = vld [vmem:[#allocation2 + $0x94] ss:$8 sps:$4 sm:$0xff]   ;;  %v672_v23 = vld [vmem:[#allocation2 + $0x90] ss:$8 sps:$4 sm:$0xff]  }
  0x1a   :  { %342 = vmatpush1.bf16.msra.mxu1 %v648_v7  ;;  %v673_v24 = vld [vmem:[#allocation2 + $0xa4] ss:$8 sps:$4 sm:$0xff]   ;;  %v675_v25 = vld [vmem:[#allocation2 + $0xa0] ss:$8 sps:$4 sm:$0xff]   ;;  %v676_v26 = vld [vmem:[#allocation2 + $0xb4] ss:$8 sps:$4 sm:$0xff]  }
  0x1b   :  { %343 = vmatprep.subr.bf16.mxu1 %v649_v8  ;;  %v678_v27 = vld [vmem:[#allocation2 + $0xb0] ss:$8 sps:$4 sm:$0xff]   ;;  %v679_v28 = vld [vmem:[#allocation2 + $0xc4] ss:$8 sps:$4 sm:$0xff]   ;;  %v681_v29 = vld [vmem:[#allocation2 + $0xc0] ss:$8 sps:$4 sm:$0xff]  }
  0x1c   :  { %v682_v30 = vld [vmem:[#allocation2 + $0xd4] ss:$8 sps:$4 sm:$0xff]   ;;  %v684_v31 = vld [vmem:[#allocation2 + $0xd0] ss:$8 sps:$4 sm:$0xff]   ;;  %v685_v32 = vld [vmem:[#allocation2 + $0xe4] ss:$8 sps:$4 sm:$0xff]  }
  0x1d   :  { %v687_v33 = vld [vmem:[#allocation2 + $0xe0] ss:$8 sps:$4 sm:$0xff]   ;;  %v688_v34 = vld [vmem:[#allocation2 + $0xf4] ss:$8 sps:$4 sm:$0xff]   ;;  %v690_v35 = vld [vmem:[#allocation2 + $0xf0] ss:$8 sps:$4 sm:$0xff]  }
  0x1e   :  { %344 = vmatpush1.bf16.msra.mxu1 %v651_v9  ;;  %v691_v36 = vld [vmem:[%s863_s5 + $0x40] sm:$0xff]   ;;  %v693_v38 = vld [vmem:[%s863_s5 + $0x48] sm:$0xff]   ;;  %v695_v40 = vld [vmem:[%s863_s5 + $0x50] sm:$0xff]   ;;  %v47_v49 = vshrl.u32 %v46_v48, 7 }
  0x1f   :  { %345 = vmatprep.subr.bf16.mxu1 %v652_v10  ;;  %v692_v37 = vld [vmem:[%s863_s5] sm:$0xff]   ;;  %617 = vmatprep.subr.bf16.mxu0 %v691_v36  ;;  %v694_v39 = vld [vmem:[%s863_s5 + $0x8] sm:$0xff]   ;;  %v696_v41 = vld [vmem:[%s863_s5 + $0x10] sm:$0xff]  }
  0x20   :  { %618 = vmatpush3.bf16.msra.mxu0 %v692_v37  ;;  %v697_v42 = vld [vmem:[%s863_s5 + $0x58] sm:$0xff]   ;;  %v699_v44 = vld [vmem:[%s863_s5 + $0x60] sm:$0xff]   ;;  %v701_v46 = vld [vmem:[%s863_s5 + $0x68] sm:$0xff]   ;;  %v48_v50 = vsub.s32 0, %v47_v49  ;;  %v52_v52 = vsub.s32 1, %v47_v49 }
  0x21   :  { %619 = vmatprep.subr.bf16.mxu0 %v693_v38  ;;  %v698_v43 = vld [vmem:[%s863_s5 + $0x18] sm:$0xff]   ;;  %v700_v45 = vld [vmem:[%s863_s5 + $0x20] sm:$0xff]   ;;  %v702_v47 = vld [vmem:[%s863_s5 + $0x28] sm:$0xff]  }
  0x22   :  { %346 = vmatpush1.bf16.msra.mxu1 %v654_v11  ;;  %v44_v51 = vld [vmem:[%s860_s2] sm:$0x3]  ;;  %v703_v63 = vld [vmem:[%s863_s5 + $0x70] sm:$0xff]   ;;  %v705_v1 = vld [vmem:[%s863_s5 + $0x78] sm:$0xff]  }
  0x23   :  { %347 = vmatprep.subr.bf16.mxu1 %v655_v12  ;;  %v49_v53 = vrot.slane %v44_v51, %v48_v50  ;;  %v53_v54 = vrot.slane %v44_v51, %v52_v52  ;;  %v704_v0 = vld [vmem:[%s863_s5 + $0x30] sm:$0xff]   ;;  %v706_v2 = vld [vmem:[%s863_s5 + $0x38] sm:$0xff]   ;;  %v167_v3 = vld [vmem:[%s862_s4] sm:$0x3] }
  0x24   :  { %620 = vmatpush3.bf16.msra.mxu0 %v694_v39  ;;  %v172_v4 = vrot.slane %v167_v3, %v48_v50  ;;  %v176_v5 = vrot.slane %v167_v3, %v52_v52 }
  0x25   :  { %621 = vmatprep.subr.bf16.mxu0 %v695_v40 }
  0x26   :  { %348 = vmatpush1.bf16.msra.mxu1 %v657_v13 }
  0x27   :  { %349 = vmatprep.subr.bf16.mxu1 %v658_v14 }
  0x28   :  { %622 = vmatpush3.bf16.msra.mxu0 %v696_v41 }
  0x29   :  { %623 = vmatprep.subr.bf16.mxu0 %v697_v42 }
  0x2a   :  { %350 = vmatpush1.bf16.msra.mxu1 %v660_v15 }
  0x2b   :  { %351 = vmatprep.subr.bf16.mxu1 %v661_v16 }
  0x2c   :  { %624 = vmatpush3.bf16.msra.mxu0 %v698_v43 }
  0x2d   :  { %625 = vmatprep.subr.bf16.mxu0 %v699_v44 }
  0x2e   :  { %352 = vmatpush1.bf16.msra.mxu1 %v663_v17  ;;  %v600_v17 = vld [vmem:[%s864_s6] ss:$0 sm:$0xff] }
  0x2f   :  { %353 = vmatprep.subr.bf16.mxu1 %v664_v18 }
  0x30   :  { %626 = vmatpush3.bf16.msra.mxu0 %v700_v45 }
  0x31   :  { %627 = vmatprep.subr.bf16.mxu0 %v701_v46 }
  0x32   :  { %354 = vmatpush1.bf16.msra.mxu1 %v666_v19 }
  0x33   :  { %355 = vmatprep.subr.bf16.mxu1 %v667_v20 }
  0x34   :  { %628 = vmatpush3.bf16.msra.mxu0 %v702_v47 }
  0x35   :  { %629 = vmatprep.subr.bf16.mxu0 %v703_v63 }
  0x36   :  { %356 = vmatpush1.bf16.msra.mxu1 %v669_v21 }
  0x37   :  { %357 = vmatprep.subr.bf16.mxu1 %v670_v22 }
  0x38   :  { %630 = vmatpush3.bf16.msra.mxu0 %v704_v0 }
  0x39   :  { %631 = vmatprep.subr.bf16.mxu0 %v705_v1 }
  0x3a   :  { %358 = vmatpush1.bf16.msra.mxu1 %v672_v23 }
  0x3b   :  { %359 = vmatprep.subr.bf16.mxu1 %v673_v24 }
  0x3c   :  { %632 = vmatpush3.bf16.msra.mxu0 %v706_v2 }
  0x3e   :  { %360 = vmatpush1.bf16.msra.mxu1 %v675_v25 }
  0x3f   :  { %361 = vmatprep.subr.bf16.mxu1 %v676_v26 }
  0x42   :  { %362 = vmatpush1.bf16.msra.mxu1 %v678_v27 }
  0x43   :  { %363 = vmatprep.subr.bf16.mxu1 %v679_v28 }
  0x46   :  { %364 = vmatpush1.bf16.msra.mxu1 %v681_v29 }
  0x47   :  { %365 = vmatprep.subr.bf16.mxu1 %v682_v30 }
  0x4a   :  { %366 = vmatpush1.bf16.msra.mxu1 %v684_v31 }
  0x4b   :  { %367 = vmatprep.subr.bf16.mxu1 %v685_v32 }
  0x4e   :  { %368 = vmatpush1.bf16.msra.mxu1 %v687_v33 }
  0x4f   :  { %369 = vmatprep.subr.bf16.mxu1 %v688_v34 }
  0x52   :  { %370 = vmatpush1.bf16.msra.mxu1 %v690_v35 }
  0xe8   :  { %v126_v55 = vpop.f32.mrb[0].mxu0 }
  0xe9   :  { %v127_v56 = vadd.f32 %v126_v55, %v49_v53  ;;  %v128_v57 = vpop.f32.mrb[1].mxu0 }
  0xea   :  { %v129_v58 = vadd.f32 %v128_v57, %v53_v54 }
  0xeb   :  { %v131_v59 = vmax.f32 %v127_v56, 0.0 }
  0xec   :  { %v132_v60 = vmax.f32 %v129_v58, 0.0 }
  0xed   :  { %v133_v62 = vpack.c.bf16 %v131_v59, %v131_v59 }
  0xee   :  { %v134_v61 = vpack.c.bf16 %v132_v60, %v132_v60 }
  0xf0   :  { %371 = vmatprep.mubr.bf16.mxu1 %v134_v61 }
  0xf1   :  { %372 = vmatmul.mubr.bf16.vlgmr.msra.gmra.mrb[0].mxu1 %v133_v62 }
 0x1c4   :  { %v373_v6 = vpop.f32.mrb[0].mxu1 }
 0x1c5   :  { %v374_v7 = vadd.f32 %v373_v6, %v172_v4  ;;  %v375_v8 = vpop.f32.mrb[1].mxu1 }
 0x1c6   :  { %v376_v9 = vadd.f32 %v375_v8, %v176_v5  ;;  %v377_v10 = vpop.f32.mrb[2].mxu1 }
 0x1c7   :  { %v380_v11 = vmax.f32 %v374_v7, 0.0  ;;  %v378_v12 = vpop.f32.mrb[3].mxu1 }
 0x1c8   :  { %v381_v13 = vmax.f32 %v376_v9, 0.0 }
 0x1c9   :  { %v382_v15 = vpack.c.bf16 %v380_v11, %v380_v11 }
 0x1ca   :  { %v383_v14 = vpack.c.bf16 %v381_v13, %v381_v13 }
 0x1cc   :  { %551 = vmatprep.mubr.bf16.mxu0 %v383_v14 }
 0x1cd   :  { %552 = vmatmul.mubr.bf16.vlgmr.msra.gmra.mrb[4].mxu0 %v382_v15 }
 0x2a0   :  { %v633_v16 = vpop.f32.mrb[4].mxu0 }
 0x2a1   :  { %v634_v18 = vpop.f32.mrb[5].mxu0 }
 0x2a2   :  { %v635_v19 = vadd.f32 %v634_v18, %v633_v16  ;;  %v636_v20 = vpop.f32.mrb[6].mxu0 }
 0x2a3   :  { %v637_v21 = vpop.f32.mrb[7].mxu0 }
 0x2a4   :  { %v554_v22 = vadd.f32 %v635_v19, %v600_v17 }
 0x2a6   :  { %707 = vtanh.f32 %v554_v22 }
 0x2b0   :  { %v708_v23 = vpop.eup %707 }
 0x2b1   :  { %561 = vst.msk [vmem:[%s865_s7] sm:$0xff] %vm560_vm1, %v708_v23 }
 0x2b2   :  { %566 = vsyncpa [#allocation3], 1 }

</bundles_post_ra>
